<compile_context>
chip_gen: v7x
topology: tpu7x:2x2x1
jax: 0.10.0
libtpu: 0.0.40
codegen_flags: <defaults>
</compile_context>

<pallas_src>
import math
from functools import partial

import jax
import jax.numpy as jnp
from jax.experimental import pallas as pl
from jax.experimental.pallas import tpu as pltpu


def _pick_row_tile(ho, cap):
    """Largest divisor of `ho` that is <= cap (output-row tile)."""
    t = max(1, min(ho, cap))
    while ho % t:
        t -= 1
    return t


def _equal_conv2d_kernel(x_ref, w_ref, b_ref, o_ref, acc_ref, *,
                         K, Cin, Cout_pad, T, Wo, scale):
    # x_ref  : (1, Hp, Wp, Cin)       whole zero-padded image (one batch elem)
    # w_ref  : (K, K, Cin, Cout_pad)  UNscaled weight, Cout padded to 128-mult
    # b_ref  : (1, Cout_pad)          bias (zero-padded)
    # o_ref  : (1, T, Wo, Cout_pad)   one tile of T output rows (lane-dense)
    # acc_ref: (T*Wo, Cout_pad)       fp32 accumulator in VMEM scratch
    h = pl.program_id(1)
    row0 = pl.multiple_of(h * T, T)

    # Rows of the padded input needed for this tile of T output rows (+ halo).
    xs = x_ref[0, pl.ds(row0, T + K - 1), :, :]          # (T+K-1, Wp, Cin)

    # equal-LR scaling on the small resident weight, not on the accumulator.
    ws = w_ref[...] * scale                              # (K, K, Cin, Cout_pad)

    # K*K shifted matmuls accumulated in fp32.  For each kw, flatten the
    # shifted slab once; per kh the tap is a cheap row-range slice of it.
    for kw in range(K):
        zk = xs[:, kw:kw + Wo, :].reshape((T + K - 1) * Wo, Cin)
        for kh in range(K):
            sub = zk[kh * Wo: kh * Wo + T * Wo]          # (T*Wo, Cin)
            contrib = jnp.dot(sub, ws[kh, kw],
                              preferred_element_type=jnp.float32)
            if kw == 0 and kh == 0:
                acc_ref[...] = contrib
            else:
                acc_ref[...] += contrib

    out = acc_ref[...] + b_ref[...].astype(jnp.float32)  # (T*Wo, Cout_pad)
    # Lane-dense store: block's last dim (Cout_pad) is a multiple of 128.
    o_ref[0] = out.reshape(T, Wo, Cout_pad).astype(o_ref.dtype)


def equal_conv2d(x_nchw, weight_oihw, bias, padding, *, row_tile=64):
    """EqualConv2d forward. x_nchw: (N, Cin, H, W); weight: (Cout, Cin, K, K)."""
    N, Cin, H, W = x_nchw.shape
    Cout, _, K, _ = weight_oihw.shape
    fan_in = Cin * K * K
    scale = math.sqrt(2.0 / fan_in)

    Hp, Wp = H + 2 * padding, W + 2 * padding
    Ho, Wo = Hp - K + 1, Wp - K + 1
    T = _pick_row_tile(Ho, row_tile)
    n_ht = Ho // T

    # Pad Cout up to a multiple of 128 so stores are 128-lane dense.
    Cout_pad = ((Cout + 127) // 128) * 128

    # Layout glue (NCHW -> NHWC, zero pad, weight OIHW -> HWIO) in plain JAX.
    x_nhwc = jnp.transpose(x_nchw, (0, 2, 3, 1))                     # (N,H,W,Cin)
    x_pad = jnp.pad(x_nhwc, ((0, 0), (padding, padding),
                             (padding, padding), (0, 0)))            # (N,Hp,Wp,Cin)
    w_hwio = jnp.transpose(weight_oihw, (2, 3, 1, 0))                # (K,K,Cin,Cout)
    if Cout_pad != Cout:
        w_hwio = jnp.pad(w_hwio, ((0, 0), (0, 0), (0, 0), (0, Cout_pad - Cout)))
        b_pad = jnp.pad(bias, (0, Cout_pad - Cout))
    else:
        b_pad = bias
    b2d = b_pad.reshape(1, Cout_pad)

    kernel = partial(_equal_conv2d_kernel, K=K, Cin=Cin, Cout_pad=Cout_pad,
                     T=T, Wo=Wo, scale=scale)

    out_padded = pl.pallas_call(
        kernel,
        out_shape=jax.ShapeDtypeStruct((N, Ho, Wo, Cout_pad), x_nchw.dtype),
        grid=(N, n_ht),
        in_specs=[
            pl.BlockSpec((1, Hp, Wp, Cin), lambda n, h: (n, 0, 0, 0)),
            pl.BlockSpec((K, K, Cin, Cout_pad), lambda n, h: (0, 0, 0, 0)),
            pl.BlockSpec((1, Cout_pad), lambda n, h: (0, 0)),
        ],
        out_specs=pl.BlockSpec((1, T, Wo, Cout_pad), lambda n, h: (n, h, 0, 0)),
        scratch_shapes=[pltpu.VMEM((T * Wo, Cout_pad), jnp.float32)],
        compiler_params=pltpu.CompilerParams(
            dimension_semantics=("parallel", "parallel")),
    )(x_pad, w_hwio, b2d)

    out_nhwc = out_padded[..., :Cout] if Cout_pad != Cout else out_padded
    return jnp.transpose(out_nhwc, (0, 3, 1, 2))                     # back to NCHW


if __name__ == "__main__":
    key = jax.random.PRNGKey(0)
    kx, kw = jax.random.split(key)

    # EqualConv2d(in_channels=4, out_channels=8, kernel_size=3, padding=1)
    N, Cin, H, W = 2, 4, 16, 16
    Cout, K, pad = 8, 3, 1

    x = jax.random.normal(kx, (N, Cin, H, W), dtype=jnp.float32)
    # conv.weight.data.normal_() ; conv.bias.data.zero_()
    weight_orig = jax.random.normal(kw, (Cout, Cin, K, K), dtype=jnp.float32)
    bias = jnp.zeros((Cout,), dtype=jnp.float32)

    # row_tile=8 -> 2 output-row tiles per image, exercising the spatial grid.
    out = equal_conv2d(x, weight_orig, bias, pad, row_tile=8)
    out = jax.block_until_ready(out)

    # Sanity check vs. XLA conv with the equal-LR scaled weight.
    scale = math.sqrt(2.0 / (Cin * K * K))
    ref = jax.lax.conv_general_dilated(
        x, weight_orig * scale, window_strides=(1, 1),
        padding=((pad, pad), (pad, pad)),
        dimension_numbers=("NCHW", "OIHW", "NCHW"),
    ) + bias[None, :, None, None]
    assert out.shape == (N, Cout, H, W)
    assert jnp.max(jnp.abs(out - ref)) < 2e-4

    print("KERNEL_OK")
</pallas_src>

<mosaic_0001>
module attributes {stable_mosaic.version = 11 : i64} {
  func.func @_equal_conv2d_kernel(%arg0: i32, %arg1: i32, %arg2: memref<1x18x18x4xf32, #tpu.memory_space<vmem>>, %arg3: memref<3x3x4x128xf32, #tpu.memory_space<vmem>>, %arg4: memref<1x128xf32, #tpu.memory_space<vmem>>, %arg5: memref<1x8x16x128xf32, #tpu.memory_space<vmem>>, %arg6: memref<128x128xf32, #tpu.memory_space<vmem>>) attributes {dimension_semantics = [#tpu.dimension_semantics<parallel>, #tpu.dimension_semantics<parallel>], iteration_bounds = array<i64: 2, 2>, scalar_prefetch = 0 : i64, scratch_operands = 1 : i64, tpu.core_type = #tpu.core_type<tc>, window_params = [{transform_indices = @transform_0, window_bounds = array<i64: 1, 18, 18, 4>}, {pipeline_mode = #tpu.pipeline_mode<synchronous>, transform_indices = @transform_1, window_bounds = array<i64: 3, 3, 4, 128>}, {pipeline_mode = #tpu.pipeline_mode<synchronous>, transform_indices = @transform_2, window_bounds = array<i64: 1, 128>}, {transform_indices = @transform_3, window_bounds = array<i64: 1, 8, 16, 128>}]} {
    %c8_i32 = arith.constant 8 : i32
    %0 = arith.muli %arg1, %c8_i32 : i32
    %1 = tpu.assume_multiple %0, 8 : i32
    %c0 = arith.constant 0 : index
    %2 = arith.index_cast %1 : i32 to index
    %c0_0 = arith.constant 0 : index
    %c0_1 = arith.constant 0 : index
    %3 = vector.load %arg2[%c0, %2, %c0_0, %c0_1] : memref<1x18x18x4xf32, #tpu.memory_space<vmem>>, vector<1x10x18x4xf32>
    %4 = vector.shape_cast %3 : vector<1x10x18x4xf32> to vector<10x18x4xf32>
    %c0_2 = arith.constant 0 : index
    %c0_3 = arith.constant 0 : index
    %c0_4 = arith.constant 0 : index
    %c0_5 = arith.constant 0 : index
    %5 = vector.load %arg3[%c0_2, %c0_3, %c0_4, %c0_5] : memref<3x3x4x128xf32, #tpu.memory_space<vmem>>, vector<3x3x4x128xf32>
    %cst = arith.constant 0.235702261 : f32
    %6 = vector.broadcast %cst : f32 to vector<3x3x4x128xf32>
    %7 = arith.mulf %5, %6 : vector<3x3x4x128xf32>
    %8 = vector.extract_strided_slice %4 {offsets = [0, 0, 0], sizes = [10, 16, 4], strides = [1, 1, 1]} : vector<10x18x4xf32> to vector<10x16x4xf32>
    %9 = vector.shape_cast %8 : vector<10x16x4xf32> to vector<160x4xf32>
    %10 = vector.extract_strided_slice %9 {offsets = [0, 0], sizes = [128, 4], strides = [1, 1]} : vector<160x4xf32> to vector<128x4xf32>
    %11 = vector.extract_strided_slice %7 {offsets = [0, 0, 0, 0], sizes = [1, 1, 4, 128], strides = [1, 1, 1, 1]} : vector<3x3x4x128xf32> to vector<1x1x4x128xf32>
    %12 = vector.shape_cast %11 : vector<1x1x4x128xf32> to vector<4x128xf32>
    %cst_6 = arith.constant dense<0.000000e+00> : vector<128x128xf32>
    %13 = tpu.matmul %10, %12, %cst_6 {dimension_numbers = #tpu.dot_dimension_numbers<[1], [0], [0], [1], [0, 0, 1, 1], [], []>} : vector<128x4xf32>, vector<4x128xf32>, vector<128x128xf32> -> vector<128x128xf32>
    %c0_7 = arith.constant 0 : index
    %c0_8 = arith.constant 0 : index
    %14 = vector.load %arg6[%c0_7, %c0_8] : memref<128x128xf32, #tpu.memory_space<vmem>>, vector<128x128xf32>
    tpu.vector_store %arg6[%c0_7, %c0_8], %13 {strides = array<i32>} : memref<128x128xf32, #tpu.memory_space<vmem>>, vector<128x128xf32>,
    %15 = vector.extract_strided_slice %9 {offsets = [16, 0], sizes = [128, 4], strides = [1, 1]} : vector<160x4xf32> to vector<128x4xf32>
    %16 = vector.extract_strided_slice %7 {offsets = [1, 0, 0, 0], sizes = [1, 1, 4, 128], strides = [1, 1, 1, 1]} : vector<3x3x4x128xf32> to vector<1x1x4x128xf32>
    %17 = vector.shape_cast %16 : vector<1x1x4x128xf32> to vector<4x128xf32>
    %cst_9 = arith.constant dense<0.000000e+00> : vector<128x128xf32>
    %18 = tpu.matmul %15, %17, %cst_9 {dimension_numbers = #tpu.dot_dimension_numbers<[1], [0], [0], [1], [0, 0, 1, 1], [], []>} : vector<128x4xf32>, vector<4x128xf32>, vector<128x128xf32> -> vector<128x128xf32>
    %c0_10 = arith.constant 0 : index
    %c0_11 = arith.constant 0 : index
    %19 = vector.load %arg6[%c0_10, %c0_11] : memref<128x128xf32, #tpu.memory_space<vmem>>, vector<128x128xf32>
    %20 = arith.addf %19, %18 : vector<128x128xf32>
    %c0_12 = arith.constant 0 : index
    %c0_13 = arith.constant 0 : index
    %21 = vector.load %arg6[%c0_12, %c0_13] : memref<128x128xf32, #tpu.memory_space<vmem>>, vector<128x128xf32>
    tpu.vector_store %arg6[%c0_12, %c0_13], %20 {strides = array<i32>} : memref<128x128xf32, #tpu.memory_space<vmem>>, vector<128x128xf32>,
    %22 = vector.extract_strided_slice %9 {offsets = [32, 0], sizes = [128, 4], strides = [1, 1]} : vector<160x4xf32> to vector<128x4xf32>
    %23 = vector.extract_strided_slice %7 {offsets = [2, 0, 0, 0], sizes = [1, 1, 4, 128], strides = [1, 1, 1, 1]} : vector<3x3x4x128xf32> to vector<1x1x4x128xf32>
    %24 = vector.shape_cast %23 : vector<1x1x4x128xf32> to vector<4x128xf32>
    %cst_14 = arith.constant dense<0.000000e+00> : vector<128x128xf32>
    %25 = tpu.matmul %22, %24, %cst_14 {dimension_numbers = #tpu.dot_dimension_numbers<[1], [0], [0], [1], [0, 0, 1, 1], [], []>} : vector<128x4xf32>, vector<4x128xf32>, vector<128x128xf32> -> vector<128x128xf32>
    %c0_15 = arith.constant 0 : index
    %c0_16 = arith.constant 0 : index
    %26 = vector.load %arg6[%c0_15, %c0_16] : memref<128x128xf32, #tpu.memory_space<vmem>>, vector<128x128xf32>
    %27 = arith.addf %26, %25 : vector<128x128xf32>
    %c0_17 = arith.constant 0 : index
    %c0_18 = arith.constant 0 : index
    %28 = vector.load %arg6[%c0_17, %c0_18] : memref<128x128xf32, #tpu.memory_space<vmem>>, vector<128x128xf32>
    tpu.vector_store %arg6[%c0_17, %c0_18], %27 {strides = array<i32>} : memref<128x128xf32, #tpu.memory_space<vmem>>, vector<128x128xf32>,
    %29 = vector.extract_strided_slice %4 {offsets = [0, 1, 0], sizes = [10, 16, 4], strides = [1, 1, 1]} : vector<10x18x4xf32> to vector<10x16x4xf32>
    %30 = vector.shape_cast %29 : vector<10x16x4xf32> to vector<160x4xf32>
    %31 = vector.extract_strided_slice %30 {offsets = [0, 0], sizes = [128, 4], strides = [1, 1]} : vector<160x4xf32> to vector<128x4xf32>
    %32 = vector.extract_strided_slice %7 {offsets = [0, 1, 0, 0], sizes = [1, 1, 4, 128], strides = [1, 1, 1, 1]} : vector<3x3x4x128xf32> to vector<1x1x4x128xf32>
    %33 = vector.shape_cast %32 : vector<1x1x4x128xf32> to vector<4x128xf32>
    %cst_19 = arith.constant dense<0.000000e+00> : vector<128x128xf32>
    %34 = tpu.matmul %31, %33, %cst_19 {dimension_numbers = #tpu.dot_dimension_numbers<[1], [0], [0], [1], [0, 0, 1, 1], [], []>} : vector<128x4xf32>, vector<4x128xf32>, vector<128x128xf32> -> vector<128x128xf32>
    %c0_20 = arith.constant 0 : index
    %c0_21 = arith.constant 0 : index
    %35 = vector.load %arg6[%c0_20, %c0_21] : memref<128x128xf32, #tpu.memory_space<vmem>>, vector<128x128xf32>
    %36 = arith.addf %35, %34 : vector<128x128xf32>
    %c0_22 = arith.constant 0 : index
    %c0_23 = arith.constant 0 : index
    %37 = vector.load %arg6[%c0_22, %c0_23] : memref<128x128xf32, #tpu.memory_space<vmem>>, vector<128x128xf32>
    tpu.vector_store %arg6[%c0_22, %c0_23], %36 {strides = array<i32>} : memref<128x128xf32, #tpu.memory_space<vmem>>, vector<128x128xf32>,
    %38 = vector.extract_strided_slice %30 {offsets = [16, 0], sizes = [128, 4], strides = [1, 1]} : vector<160x4xf32> to vector<128x4xf32>
    %39 = vector.extract_strided_slice %7 {offsets = [1, 1, 0, 0], sizes = [1, 1, 4, 128], strides = [1, 1, 1, 1]} : vector<3x3x4x128xf32> to vector<1x1x4x128xf32>
    %40 = vector.shape_cast %39 : vector<1x1x4x128xf32> to vector<4x128xf32>
    %cst_24 = arith.constant dense<0.000000e+00> : vector<128x128xf32>
    %41 = tpu.matmul %38, %40, %cst_24 {dimension_numbers = #tpu.dot_dimension_numbers<[1], [0], [0], [1], [0, 0, 1, 1], [], []>} : vector<128x4xf32>, vector<4x128xf32>, vector<128x128xf32> -> vector<128x128xf32>
    %c0_25 = arith.constant 0 : index
    %c0_26 = arith.constant 0 : index
    %42 = vector.load %arg6[%c0_25, %c0_26] : memref<128x128xf32, #tpu.memory_space<vmem>>, vector<128x128xf32>
    %43 = arith.addf %42, %41 : vector<128x128xf32>
    %c0_27 = arith.constant 0 : index
    %c0_28 = arith.constant 0 : index
    %44 = vector.load %arg6[%c0_27, %c0_28] : memref<128x128xf32, #tpu.memory_space<vmem>>, vector<128x128xf32>
    tpu.vector_store %arg6[%c0_27, %c0_28], %43 {strides = array<i32>} : memref<128x128xf32, #tpu.memory_space<vmem>>, vector<128x128xf32>,
    %45 = vector.extract_strided_slice %30 {offsets = [32, 0], sizes = [128, 4], strides = [1, 1]} : vector<160x4xf32> to vector<128x4xf32>
    %46 = vector.extract_strided_slice %7 {offsets = [2, 1, 0, 0], sizes = [1, 1, 4, 128], strides = [1, 1, 1, 1]} : vector<3x3x4x128xf32> to vector<1x1x4x128xf32>
    %47 = vector.shape_cast %46 : vector<1x1x4x128xf32> to vector<4x128xf32>
    %cst_29 = arith.constant dense<0.000000e+00> : vector<128x128xf32>
    %48 = tpu.matmul %45, %47, %cst_29 {dimension_numbers = #tpu.dot_dimension_numbers<[1], [0], [0], [1], [0, 0, 1, 1], [], []>} : vector<128x4xf32>, vector<4x128xf32>, vector<128x128xf32> -> vector<128x128xf32>
    %c0_30 = arith.constant 0 : index
    %c0_31 = arith.constant 0 : index
    %49 = vector.load %arg6[%c0_30, %c0_31] : memref<128x128xf32, #tpu.memory_space<vmem>>, vector<128x128xf32>
    %50 = arith.addf %49, %48 : vector<128x128xf32>
    %c0_32 = arith.constant 0 : index
    %c0_33 = arith.constant 0 : index
    %51 = vector.load %arg6[%c0_32, %c0_33] : memref<128x128xf32, #tpu.memory_space<vmem>>, vector<128x128xf32>
    tpu.vector_store %arg6[%c0_32, %c0_33], %50 {strides = array<i32>} : memref<128x128xf32, #tpu.memory_space<vmem>>, vector<128x128xf32>,
    %52 = vector.extract_strided_slice %4 {offsets = [0, 2, 0], sizes = [10, 16, 4], strides = [1, 1, 1]} : vector<10x18x4xf32> to vector<10x16x4xf32>
    %53 = vector.shape_cast %52 : vector<10x16x4xf32> to vector<160x4xf32>
    %54 = vector.extract_strided_slice %53 {offsets = [0, 0], sizes = [128, 4], strides = [1, 1]} : vector<160x4xf32> to vector<128x4xf32>
    %55 = vector.extract_strided_slice %7 {offsets = [0, 2, 0, 0], sizes = [1, 1, 4, 128], strides = [1, 1, 1, 1]} : vector<3x3x4x128xf32> to vector<1x1x4x128xf32>
    %56 = vector.shape_cast %55 : vector<1x1x4x128xf32> to vector<4x128xf32>
    %cst_34 = arith.constant dense<0.000000e+00> : vector<128x128xf32>
    %57 = tpu.matmul %54, %56, %cst_34 {dimension_numbers = #tpu.dot_dimension_numbers<[1], [0], [0], [1], [0, 0, 1, 1], [], []>} : vector<128x4xf32>, vector<4x128xf32>, vector<128x128xf32> -> vector<128x128xf32>
    %c0_35 = arith.constant 0 : index
    %c0_36 = arith.constant 0 : index
    %58 = vector.load %arg6[%c0_35, %c0_36] : memref<128x128xf32, #tpu.memory_space<vmem>>, vector<128x128xf32>
    %59 = arith.addf %58, %57 : vector<128x128xf32>
    %c0_37 = arith.constant 0 : index
    %c0_38 = arith.constant 0 : index
    %60 = vector.load %arg6[%c0_37, %c0_38] : memref<128x128xf32, #tpu.memory_space<vmem>>, vector<128x128xf32>
    tpu.vector_store %arg6[%c0_37, %c0_38], %59 {strides = array<i32>} : memref<128x128xf32, #tpu.memory_space<vmem>>, vector<128x128xf32>,
    %61 = vector.extract_strided_slice %53 {offsets = [16, 0], sizes = [128, 4], strides = [1, 1]} : vector<160x4xf32> to vector<128x4xf32>
    %62 = vector.extract_strided_slice %7 {offsets = [1, 2, 0, 0], sizes = [1, 1, 4, 128], strides = [1, 1, 1, 1]} : vector<3x3x4x128xf32> to vector<1x1x4x128xf32>
    %63 = vector.shape_cast %62 : vector<1x1x4x128xf32> to vector<4x128xf32>
    %cst_39 = arith.constant dense<0.000000e+00> : vector<128x128xf32>
    %64 = tpu.matmul %61, %63, %cst_39 {dimension_numbers = #tpu.dot_dimension_numbers<[1], [0], [0], [1], [0, 0, 1, 1], [], []>} : vector<128x4xf32>, vector<4x128xf32>, vector<128x128xf32> -> vector<128x128xf32>
    %c0_40 = arith.constant 0 : index
    %c0_41 = arith.constant 0 : index
    %65 = vector.load %arg6[%c0_40, %c0_41] : memref<128x128xf32, #tpu.memory_space<vmem>>, vector<128x128xf32>
    %66 = arith.addf %65, %64 : vector<128x128xf32>
    %c0_42 = arith.constant 0 : index
    %c0_43 = arith.constant 0 : index
    %67 = vector.load %arg6[%c0_42, %c0_43] : memref<128x128xf32, #tpu.memory_space<vmem>>, vector<128x128xf32>
    tpu.vector_store %arg6[%c0_42, %c0_43], %66 {strides = array<i32>} : memref<128x128xf32, #tpu.memory_space<vmem>>, vector<128x128xf32>,
    %68 = vector.extract_strided_slice %53 {offsets = [32, 0], sizes = [128, 4], strides = [1, 1]} : vector<160x4xf32> to vector<128x4xf32>
    %69 = vector.extract_strided_slice %7 {offsets = [2, 2, 0, 0], sizes = [1, 1, 4, 128], strides = [1, 1, 1, 1]} : vector<3x3x4x128xf32> to vector<1x1x4x128xf32>
    %70 = vector.shape_cast %69 : vector<1x1x4x128xf32> to vector<4x128xf32>
    %cst_44 = arith.constant dense<0.000000e+00> : vector<128x128xf32>
    %71 = tpu.matmul %68, %70, %cst_44 {dimension_numbers = #tpu.dot_dimension_numbers<[1], [0], [0], [1], [0, 0, 1, 1], [], []>} : vector<128x4xf32>, vector<4x128xf32>, vector<128x128xf32> -> vector<128x128xf32>
    %c0_45 = arith.constant 0 : index
    %c0_46 = arith.constant 0 : index
    %72 = vector.load %arg6[%c0_45, %c0_46] : memref<128x128xf32, #tpu.memory_space<vmem>>, vector<128x128xf32>
    %73 = arith.addf %72, %71 : vector<128x128xf32>
    %c0_47 = arith.constant 0 : index
    %c0_48 = arith.constant 0 : index
    %74 = vector.load %arg6[%c0_47, %c0_48] : memref<128x128xf32, #tpu.memory_space<vmem>>, vector<128x128xf32>
    tpu.vector_store %arg6[%c0_47, %c0_48], %73 {strides = array<i32>} : memref<128x128xf32, #tpu.memory_space<vmem>>, vector<128x128xf32>,
    %c0_49 = arith.constant 0 : index
    %c0_50 = arith.constant 0 : index
    %75 = vector.load %arg6[%c0_49, %c0_50] : memref<128x128xf32, #tpu.memory_space<vmem>>, vector<128x128xf32>
    %c0_51 = arith.constant 0 : index
    %c0_52 = arith.constant 0 : index
    %76 = vector.load %arg4[%c0_51, %c0_52] : memref<1x128xf32, #tpu.memory_space<vmem>>, vector<1x128xf32>
    %77 = vector.broadcast %76 : vector<1x128xf32> to vector<128x128xf32>
    %78 = arith.addf %75, %77 : vector<128x128xf32>
    %79 = vector.shape_cast %78 : vector<128x128xf32> to vector<8x16x128xf32>
    %c0_53 = arith.constant 0 : index
    %c0_54 = arith.constant 0 : index
    %c0_55 = arith.constant 0 : index
    %c0_56 = arith.constant 0 : index
    %80 = vector.load %arg5[%c0_53, %c0_54, %c0_55, %c0_56] : memref<1x8x16x128xf32, #tpu.memory_space<vmem>>, vector<1x8x16x128xf32>
    %81 = vector.shape_cast %80 : vector<1x8x16x128xf32> to vector<8x16x128xf32>
    %82 = vector.shape_cast %79 : vector<8x16x128xf32> to vector<1x8x16x128xf32>
    tpu.vector_store %arg5[%c0_53, %c0_54, %c0_55, %c0_56], %82 {strides = array<i32>} : memref<1x8x16x128xf32, #tpu.memory_space<vmem>>, vector<1x8x16x128xf32>,
    return
  }
  func.func @transform_0(%arg0: i32, %arg1: i32) -> (i32, i32, i32, i32) {
    %c0_i32 = arith.constant 0 : i32
    %c0_i32_0 = arith.constant 0 : i32
    %c0_i32_1 = arith.constant 0 : i32
    %c0_i32_2 = arith.constant 0 : i32
    return %arg0, %c0_i32, %c0_i32_0, %c0_i32_1 : i32, i32, i32, i32
  }
  func.func @transform_1(%arg0: i32, %arg1: i32) -> (i32, i32, i32, i32) {
    %c0_i32 = arith.constant 0 : i32
    %c0_i32_0 = arith.constant 0 : i32
    %c0_i32_1 = arith.constant 0 : i32
    %c0_i32_2 = arith.constant 0 : i32
    %c0_i32_3 = arith.constant 0 : i32
    return %c0_i32, %c0_i32_0, %c0_i32_1, %c0_i32_2 : i32, i32, i32, i32
  }
  func.func @transform_2(%arg0: i32, %arg1: i32) -> (i32, i32) {
    %c0_i32 = arith.constant 0 : i32
    %c0_i32_0 = arith.constant 0 : i32
    %c0_i32_1 = arith.constant 0 : i32
    return %c0_i32, %c0_i32_0 : i32, i32
  }
  func.func @transform_3(%arg0: i32, %arg1: i32) -> (i32, i32, i32, i32) {
    %c0_i32 = arith.constant 0 : i32
    %c0_i32_0 = arith.constant 0 : i32
    %c0_i32_1 = arith.constant 0 : i32
    return %arg0, %arg1, %c0_i32, %c0_i32_0 : i32, i32, i32, i32
  }
}

</mosaic_0001>

<bundles_post_ra>
// kernel: tpu_custom_call.1
= control target key start
LH: loop header
LB: loop body
LE: loop exit
PB: predicated region body
PF: predicated region fallthrough
CT: control target
= control target key end

     0   :  { %8 = vsyncpa [#allocation4], 0  ;;  %s4049_s0 = inlined_call_operand.vmem [shape: f32[2,18,18,4], index: 0, kind: input, shape index: {}]   ;;  %s4050_s1 = inlined_call_operand.vmem [shape: f32[3,3,4,128], index: 1, kind: input, shape index: {}]   ;;  %s4051_s2 = inlined_call_operand.vmem [shape: f32[1,128], index: 2, kind: input, shape index: {}]   ;;  %s4052_s3 = inlined_call_operand.hbm [shape: f32[2,16,16,128], index: 3, kind: output, shape index: {}]  }
   0x1   :  { %10 = vsyncpa [#allocation4 + $0x1], 0  ;;  %s3252_s12 = smov 0   ;;  %s3254_s13 = smov 0  }
   0x2   :  { %s3256_s14 = smov 0   ;;  %s3258_s15 = smov 0  }
   0x3   :  { %s3260_s16 = smov 0   ;;  %s3262_s17 = smov 0  }
   0x4   :  { %s3264_s18 = smov 0   ;;  %s3266_s19 = smov 0  }
   0x5 LB: > { %s2371_s20 = sadd.s32 4294967295, %s3227_s19   ;;  %s2372_s21 = sadd.s32 4294967294, %s3227_s19   ;;  %s3227_s19 = sphi %s3266_s19, %s16_s19   ;;  %s3223_s18 = sphi %s3264_s18, %s4061_s18   ;;  %s3219_s17 = sphi %s3262_s17, %s4060_s17   ;;  %s3215_s16 = sphi %s3260_s16, %s4059_s16   ;;  %s3211_s15 = sphi %s3258_s15, %s4058_s15   ;;  %s3207_s14 = sphi %s3256_s14, %s4057_s14   ;;  %s3203_s13 = sphi %s3254_s13, %s4056_s13   ;;  %s3199_s12 = sphi %s3252_s12, %s4055_s12  }
   0x6   : > { %s25_s22 = sadd.s32 1, %s3219_s17  ;;  %s28_s23 = sadd.s32 1, %s3223_s18 }
   0x7   : > { %p26_p0 = scmp.ge.s32.totalorder %s25_s22, 2  ;;  %p115_p1 = scmp.ne.s32.totalorder %s3207_s14, %s3203_s13 }
   0x8   : > { %p116_p2 = scmp.eq.s32.totalorder %s2371_s20, 3  ;;  %p121_p5 = scmp.ne.s32.totalorder %s3203_s13, %s3199_s12 }
   0x9   : > { %s4063_s22 = smov (%p26_p0, %s25_s22), 0  ;;  %s4065_s23 = smov (!%p26_p0, %s28_s23), %s3223_s18 }
   0xa   : > { %s101_s24 = ssub.s32 %s3219_s17, %s4063_s22  ;;  %p3303_p3 = por %p116_p2, %p115_p1 }
   0xb   : > { %p30_p4 = scmp.ge.s32.totalorder %s4065_s23, 2  ;;  %p122_p6 = scmp.eq.s32.totalorder %s2372_s21, 3 }
   0xc   : > { %p2375_p7 = scmp.ge.s32.totalorder %s3227_s19, 1  ;;  %p154_p9 = scmp.lt.s32.totalorder %s3227_s19, 5 }
   0xd   : > { %s4067_s23 = smov (%p30_p4, %s4065_s23), 0  ;;  %p3312_p8 = por %p122_p6, %p121_p5 }
   0xe   : > { %s100_s27 = ssub.s32 %s3223_s18, %s4067_s23  ;;  %s105_s28 = sadd.s32 1, %s3207_s14 }
   0xf   : > { %s102_s29 = sor.u32 %s101_s24, %s100_s27  ;;  %p155_p10 = pnand %p2375_p7, %p154_p9 }
  0x10   : > { %p103_p11 = scmp.eq.s32.totalorder %s102_s29, 0  ;;  %v217_v0 = vld [vmem:[%s4050_s1] sm:$0xf] (!%p155_p10)  ;;  %vm284_vm0 = vcmask (!%p155_p10), 1043456   ;;  %p178_p12 = scmp.lt.s32.totalorder (!%p155_p10), %s3215_s16, 1  ;;  %vm235_vm1 = vcmask (!%p155_p10), 31744  }
  0x11   : > { %158 = sbr.rel (%p155_p10) target bundleno = 408 (0x198), region = 32  ;;  %v226_v1 = vmul.f32 (!%p155_p10), 0.23570226, %v217_v0  ;;  %v221_v2 = vld [vmem:[%s4050_s1 + $0x10] sm:$0xf] (!%p155_p10)  ;;  %vm863_vm2 = vcmask (!%p155_p10), 1046528  }
  0x12   : > { %s3321_s30 = scalar_select %p103_p11, %s3207_s14, %s105_s28  }
  0x13   : > { %v220_v3 = vld [vmem:[%s4050_s1 + $0xc] sm:$0xf] (!%p155_p10)  ;;  %v3334_v4 = vmul.f32 (!%p155_p10), 0.23570226, %v221_v2  ;;  %2695 = vmatprep.subr.msk.mxu1 (!%p155_p10), %vm284_vm0, %v226_v1  ;;  %s2379_s11 = smul.u32 (!%p155_p10), 192, %s3211_s15  ;;  %vm1542_vm3 = vcmask (!%p155_p10), 1045504  }
  0x14   : > { %v229_v5 = vmul.f32 (!%p155_p10), 0.23570226, %v220_v3  ;;  %v224_v6 = vld [vmem:[%s4050_s1 + $0x1c] sm:$0xf] (!%p155_p10)  ;;  %2696 = vmatpush3.msk.msra.mxu1 (!%p155_p10), %vm284_vm0, %v226_v1  ;;  %v223_v8 = vld [vmem:[%s4050_s1 + $0x18] sm:$0xf] (!%p155_p10) }
  0x15   : > { %2799 = vmatprep.subr.msk.mxu0 (!%p155_p10), %vm284_vm0, %v3334_v4  ;;  %v233_v7 = vmul.f32 (!%p155_p10), 0.23570226, %v224_v6  ;;  %v219_v9 = vld [vmem:[%s4050_s1 + $0x8] sm:$0xf] (!%p155_p10)  ;;  %v3368_v13 = vmul.f32 (!%p155_p10), 0.23570226, %v223_v8 }
  0x16   : > { %2800 = vmatpush3.msk.msra.mxu0 (!%p155_p10), %vm284_vm0, %v3334_v4  ;;  %2721 = vmatprep.subr.msk.mxu1 (!%p155_p10), %vm284_vm0, %v229_v5  ;;  %v3380_v18 = vmul.f32 (!%p155_p10), 0.23570226, %v219_v9  ;;  %v222_v50 = vld [vmem:[%s4050_s1 + $0x14] sm:$0xf] (!%p155_p10)  ;;  %s175_s27 = sand.u32 (!%p155_p10), 1, %s3203_s13   ;;  %s2541_s6 = sshll.u32 (!%p155_p10), %s3211_s15, 4 }
  0x17   : > { %2825 = vmatprep.subr.msk.mxu0 (!%p155_p10), %vm284_vm0, %v233_v7  ;;  %v3503_v52 = vmul.f32 (!%p155_p10), 0.23570226, %v222_v50  ;;  %s2376_s28 = sshll.u32 (!%p155_p10), %s175_s27, 7  ;;  %s2537_s7 = sshll.u32 (!%p155_p10), %s3215_s16, 5 }
  0x18   : > { %s179_s10 = scalar_select %p178_p12, %s3215_s16, 1 }
  0x19   : > { %s3997_s20 = scalar_lea.sflag [#allocation4], %s175_s27 }
  0x1a   : > { %s3059_s24 = smul.u32 432, %s179_s10 }
  0x1c   : > { %s182_s5 = scalar_lea.vmem %s4049_s0, %s3059_s24  ;;  %s3229_s24 = smov [#allocation3]  }
  0x1d   : > { %s3357_s8 = scalar_lea.vmem %s182_s5, %s2379_s11  ;;  %s3953_s5 = scalar_lea.vmem [#allocation3], %s2376_s28 }
  0x1e   : > { %v3360_v10 = vld [vmem:[%s3357_s8] sm:$0xff]  ;;  %v3363_v11 = vld [vmem:[%s3357_s8 + $0x8] sm:$0xff]  ;;  %v3366_v12 = vld [vmem:[%s3357_s8 + $0x18] sm:$0xff]  ;;  %s2293_s16 = sshll.u32 %s3953_s5, 4  ;;  %s3137_s28 = sshll.u32 %s3229_s24, 4  ;;  %s3990_s16 = int_to_ptr.vmem [resolvable:$true] %s2293_s16  ;;  %s3138_s28 = int_to_ptr.vmem [resolvable:$false] %s3137_s28 }
  0x1f   : > { %2697 = vmatprep.mubr.msk.f32.mxu1 %vm235_vm1, %v3360_v10  ;;  %v864_v14 = vrot.slane %v3360_v10, 1  ;;  %v865_v15 = vrot.slane %v3363_v11, 1  ;;  %v3375_v16 = vld [vmem:[%s3357_s8 + $0x20] sm:$0xff]  ;;  %v3378_v17 = vld [vmem:[%s3357_s8 + $0x30] sm:$0xff]  ;;  %v869_v19 = vrot.slane %v3366_v12, 1  ;;  %v3390_v22 = vld [vmem:[%s3357_s8 + $0x38] sm:$0xff]  ;;  %p3140_p2 = scmp.lt.s32.totalorder %s3990_s16, %s3138_s28 }
  0x20   : > { %2698 = vmatmul.mubr.msk.f32.vlgmr.msra.gmra.mrb[0].mxu1 %vm235_vm1, %v3363_v11  ;;  %v870_v20 = vrot.slane %v3375_v16, 1  ;;  %v3387_v21 = vld [vmem:[%s3357_s8 + $0x28] sm:$0x3]  ;;  %v874_v23 = vrot.slane %v3378_v17, 1  ;;  %v875_v25 = vrot.slane %v3390_v22, 1  ;;  %v3405_v28 = vld [vmem:[%s3357_s8 + $0x50] sm:$0xff] }
  0x21   : > { %2700 = vmatprep.mubr.msk.f32.mxu1 %vm235_vm1, %v3366_v12  ;;  %2722 = vmatpush3.msk.msra.mxu1 %vm284_vm0, %v229_v5  ;;  %v872_v24 = vrot.slane %v3387_v21, 1  ;;  %v3399_v26 = vld [vmem:[%s3357_s8 + $0x40] sm:$0x3]  ;;  %v3402_v27 = vld [vmem:[%s3357_s8 + $0x48] sm:$0xff]  ;;  %v3410_v29 = vsel %vm863_vm2, %v864_v14, %v865_v15  ;;  %v880_v33 = vrot.slane %v3405_v28, 1  ;;  %v3487_v49 = vld [vmem:[%s3357_s8 + $0x78] sm:$0xff] }
  0x22   : > { %v3413_v30 = vsel %vm863_vm2, %v869_v19, %v870_v20  ;;  %v877_v31 = vrot.slane %v3399_v26, 1  ;;  %v879_v32 = vrot.slane %v3402_v27, 1  ;;  %v3419_v34 = vld [vmem:[%s3357_s8 + $0x58] sm:$0x3]  ;;  %2747 = vmatprep.subr.msk.mxu1 %vm284_vm0, %v3368_v13  ;;  %v3429_v36 = vsel %vm863_vm2, %v874_v23, %v875_v25  ;;  %v3432_v37 = vld [vmem:[%s3357_s8 + $0x60] sm:$0xff]  ;;  %v3435_v38 = vld [vmem:[%s3357_s8 + $0x68] sm:$0xff] }
  0x23   : > { %2801 = vmatprep.mubr.msk.f32.mxu0 %vm235_vm1, %v3413_v30  ;;  %v3426_v35 = vsel %vm863_vm2, %v870_v20, %v872_v24  ;;  %v882_v40 = vrot.slane %v3419_v34, 1  ;;  %v884_v42 = vrot.slane %v3432_v37, 1  ;;  %v885_v43 = vrot.slane %v3435_v38, 1  ;;  %v3456_v44 = vld [vmem:[%s3357_s8 + $0x70] sm:$0x3]  ;;  %v3501_v51 = vld [vmem:[%s3357_s8 + $0x80] sm:$0xff] }
  0x24   : > { %2802 = vmatmul.mubr.msk.f32.vlgmr.msra.gmra.mrb[0].mxu0 %vm235_vm1, %v3426_v35  ;;  %2701 = vmatmul.mubr.msk.f32.gmra.mrb[2].mxu1 %vm235_vm1, %v3375_v16  ;;  %v3445_v39 = vsel %vm863_vm2, %v875_v25, %v877_v31  ;;  %v3451_v41 = vsel %vm863_vm2, %v879_v32, %v880_v33  ;;  %v887_v46 = vrot.slane %v3456_v44, 1  ;;  %v3506_v53 = vld [vmem:[%s3357_s8 + $0x90] sm:$0xff]  ;;  %v3521_v56 = vld [vmem:[%s3357_s8 + $0x98] sm:$0xff]  ;;  %v3524_v57 = vld [vmem:[%s3357_s8 + $0xa8] sm:$0xff]  ;;  %v889_v58 = vrot.slane %v3487_v49, 1  ;;  %s3133_s21 = scalar_lea.vmem %s3990_s16, 2048 }
  0x25   : > { %2826 = vmatpush3.msk.msra.mxu0 %vm284_vm0, %v233_v7  ;;  %2804 = vmatprep.mubr.msk.f32.mxu0 %vm235_vm1, %v3429_v36  ;;  %v3469_v45 = vsel %vm863_vm2, %v880_v33, %v882_v40  ;;  %v3473_v47 = vsel %vm863_vm2, %v884_v42, %v885_v43  ;;  %v3509_v54 = vld [vmem:[%s3357_s8 + $0x10] sm:$0x3]  ;;  %v890_v59 = vrot.slane %v3501_v51, 1  ;;  %v3531_v60 = vld [vmem:[%s3357_s8 + $0x88] sm:$0x3]  ;;  %v3534_v61 = vld [vmem:[%s3357_s8 + $0xe0] sm:$0xff]  ;;  %p3134_p13 = scmp.ne.s32.totalorder %s3990_s16, %s3133_s21 }
  0x26   : > { %2703 = vmatprep.mubr.msk.f32.mxu1 %vm235_vm1, %v3378_v17  ;;  %2851 = vmatprep.subr.msk.mxu0 %vm284_vm0, %v3380_v18  ;;  %v3484_v48 = vsel %vm863_vm2, %v885_v43, %v887_v46  ;;  %v867_v55 = vrot.slane %v3509_v54, 1  ;;  %v3537_v62 = vld [vmem:[%s3357_s8 + $0xe8] sm:$0x3]  ;;  %v1589_v0 = vrot.slane %v3534_v61, 2  ;;  %v3557_v2 = vld [vmem:[%s3357_s8 + $0xb0] sm:$0xff]  ;;  %v892_v3 = vrot.slane %v3531_v60, 1 }
  0x27   : > { %v1591_v1 = vrot.slane %v3537_v62, 2  ;;  %v3566_v6 = vsel %vm863_vm2, %v889_v58, %v890_v59  ;;  %v894_v7 = vrot.slane %v3506_v53, 1  ;;  %v895_v8 = vrot.slane %v3521_v56, 1  ;;  %v3571_v9 = vld [vmem:[%s3357_s8 + $0xa0] sm:$0x3]  ;;  %v3600_v31 = vld [vmem:[%s3357_s8 + $0xc8] sm:$0xff]  ;;  %p3135_p0 = pnand %p3134_p13, %p3303_p3 }
  0x28   : > { %2805 = vmatmul.mubr.msk.f32.gmra.mrb[2].mxu0 %vm235_vm1, %v3445_v39  ;;  %2704 = vmatmul.mubr.msk.f32.gmra.mrb[4].mxu1 %vm235_vm1, %v3390_v22  ;;  %v3544_v63 = vsel %vm863_vm2, %v865_v15, %v867_v55  ;;  %v218_v14 = vld [vmem:[%s4050_s1 + $0x4] sm:$0xf]  ;;  %v3585_v15 = vsel %vm863_vm2, %v890_v59, %v892_v3  ;;  %v899_v20 = vrot.slane %v3524_v57, 1  ;;  %v900_v23 = vrot.slane %v3557_v2, 1  ;;  %v3594_v24 = vld [vmem:[%s3357_s8 + $0xb8] sm:$0x3] }
  0x29   : > { %2807 = vmatprep.mubr.msk.f32.mxu0 %vm235_vm1, %v3451_v41  ;;  %2706 = vmatprep.mubr.msk.f32.mxu1 %vm235_vm1, %v3402_v27  ;;  %v3563_v5 = vsel %vm1542_vm3, %v1589_v0, %v1591_v1  ;;  %v3589_v19 = vsel %vm863_vm2, %v894_v7, %v895_v8  ;;  %v3597_v25 = vld [vmem:[%s3357_s8 + $0xc0] sm:$0xff]  ;;  %v3602_v32 = vmul.f32 0.23570226, %v218_v14  ;;  %v902_v40 = vrot.slane %v3594_v24, 1  ;;  %v3624_v50 = vld [vmem:[%s3357_s8 + $0xd0] sm:$0x3]  ;;  %p3136_p1 = pneg %p3135_p0 }
  0x2a   : > { %v3619_v42 = vsel %vm863_vm2, %v899_v20, %v900_v23  ;;  %v904_v43 = vrot.slane %v3597_v25, 1  ;;  %v905_v46 = vrot.slane %v3600_v31, 1  ;;  %v3627_v55 = vld [vmem:[%s3357_s8 + $0xd8] sm:$0xff]  ;;  %v907_v58 = vrot.slane %v3624_v50, 1  ;;  %s2290_s8 = sadd.s32 %s2541_s6, %s2537_s7  ;;  %s3139_s29 = scalar_lea.vmem %s3138_s28, 4096 }
  0x2b   : > { %v909_v1 = vrot.slane %v3627_v55, 1  ;;  %v910_v3 = vrot.slane %v3534_v61, 1  ;;  %v1543_v14 = vrot.slane %v3360_v10, 2  ;;  %s2538_s15 = sshll.u32 %s2290_s8, 7  ;;  %p3141_p4 = scmp.lt.s32.totalorder %s3139_s29, %s3133_s21 }
  0x2c   : > { %2808 = vmatmul.mubr.msk.f32.gmra.mrb[4].mxu0 %vm235_vm1, %v3469_v45  ;;  %2707 = vmatmul.mubr.msk.f32.gmra.mrb[6].mxu1 %vm235_vm1, %v3405_v28  ;;  %v3644_v59 = vsel %vm863_vm2, %v904_v43, %v905_v46  ;;  %v3657_v7 = vsel %vm863_vm2, %v905_v46, %v907_v58  ;;  %v225_v43 = vld [vmem:[%s4050_s1 + $0x20] sm:$0xf]  ;;  %v1553_v46 = vrot.slane %v3378_v17, 2  ;;  %v1554_v58 = vrot.slane %v3390_v22, 2  ;;  %s3988_s11 = scalar_lea.hbm %s4052_s3, %s2538_s15 }
  0x2d   : > { %2810 = vmatprep.mubr.msk.f32.mxu0 %vm235_vm1, %v3473_v47  ;;  %2709 = vmatprep.mubr.msk.f32.mxu1 %vm235_vm1, %v3432_v37  ;;  %v911_v20 = vsel %vm863_vm2, %v909_v1, %v910_v3  ;;  %v3691_v1 = vmul.f32 0.23570226, %v225_v43  ;;  %v1569_v43 = vrot.slane %v3501_v51, 2  ;;  %p3142_p5 = por %p3141_p4, %p3140_p2 }
  0x2f   : > { %p3143_p6 = pnand %p3142_p5, %p3136_p1 }
  0x30   : > { %2811 = vmatmul.mubr.msk.f32.gmra.mrb[6].mxu0 %vm235_vm1, %v3484_v48  ;;  %2710 = vmatmul.mubr.msk.f32.gmra.mrb[8].mxu1 %vm235_vm1, %v3435_v38 }
  0x31   : > { %2827 = vmatprep.mubr.msk.f32.mxu0 %vm235_vm1, %v3429_v36  ;;  %2712 = vmatprep.mubr.msk.f32.mxu1 %vm235_vm1, %v3487_v49 }
  0x34   : > { %2828 = vmatmul.mubr.msk.f32.vlgmr.msra.gmra.mrb[0].mxu0 %vm235_vm1, %v3445_v39  ;;  %2713 = vmatmul.mubr.msk.f32.gmra.mrb[10].mxu1 %vm235_vm1, %v3501_v51 }
  0x35   : > { %2852 = vmatpush3.msk.msra.mxu0 %vm284_vm0, %v3380_v18  ;;  %2830 = vmatprep.mubr.msk.f32.mxu0 %vm235_vm1, %v3451_v41  ;;  %v897_v18 = vrot.slane %v3571_v9, 1 }
  0x36   : > { %2715 = vmatprep.mubr.msk.f32.mxu1 %vm235_vm1, %v3506_v53  ;;  %2877 = vmatprep.subr.msk.mxu0 %vm284_vm0, %v3503_v52 }
  0x37   : > { %v3613_v33 = vsel %vm863_vm2, %v895_v8, %v897_v18  ;;  %v912_v8 = vrot.slane %v3537_v62, 1  ;;  %v1544_v18 = vrot.slane %v3363_v11, 2  ;;  %v1546_v62 = vrot.slane %v3509_v54, 2 }
  0x38   : > { %2831 = vmatmul.mubr.msk.f32.gmra.mrb[2].mxu0 %vm235_vm1, %v3469_v45  ;;  %2716 = vmatmul.mubr.msk.f32.gmra.mrb[12].mxu1 %vm235_vm1, %v3521_v56  ;;  %v1548_v11 = vrot.slane %v3366_v12, 2 }
  0x39   : > { %2833 = vmatprep.mubr.msk.f32.mxu0 %vm235_vm1, %v3473_v47  ;;  %2718 = vmatprep.mubr.msk.f32.mxu1 %vm235_vm1, %v3524_v57  ;;  %v1545_v10 = vsel %vm1542_vm3, %v1543_v14, %v1544_v18  ;;  %v1547_v54 = vsel %vm1542_vm3, %v1544_v18, %v1546_v62  ;;  %v1558_v14 = vrot.slane %v3402_v27, 2  ;;  %v1559_v18 = vrot.slane %v3405_v28, 2 }
  0x3a   : > { %v1564_v62 = vrot.slane %v3435_v38, 2 }
  0x3c   : > { %2834 = vmatmul.mubr.msk.f32.gmra.mrb[4].mxu0 %vm235_vm1, %v3484_v48  ;;  %2719 = vmatmul.mubr.msk.f32.gmra.mrb[14].mxu1 %vm235_vm1, %v3557_v2 }
  0x3d   : > { %2836 = vmatprep.mubr.msk.f32.mxu0 %vm235_vm1, %v3566_v6  ;;  %2723 = vmatprep.mubr.msk.f32.mxu1 %vm235_vm1, %v3366_v12  ;;  %v1551_v12 = vrot.slane %v3387_v21, 2 }
  0x40   : > { %2837 = vmatmul.mubr.msk.f32.gmra.mrb[6].mxu0 %vm235_vm1, %v3585_v15  ;;  %2724 = vmatmul.mubr.msk.f32.vlgmr.msra.gmra.mrb[0].mxu1 %vm235_vm1, %v3375_v16 }
  0x41   : > { %2839 = vmatprep.mubr.msk.f32.mxu0 %vm235_vm1, %v3589_v19  ;;  %2726 = vmatprep.mubr.msk.f32.mxu1 %vm235_vm1, %v3378_v17 }
  0x42   : > { %2748 = vmatpush3.msk.msra.mxu1 %vm284_vm0, %v3368_v13  ;;  %v3640_v13 = vsel %vm863_vm2, %v900_v23, %v902_v40  ;;  %v913_v23 = vsel %vm863_vm2, %v910_v3, %v912_v8  ;;  %v1549_v40 = vrot.slane %v3375_v16, 2  ;;  %v1556_v3 = vrot.slane %v3399_v26, 2 }
  0x43   : > { %2773 = vmatprep.subr.msk.mxu1 %vm284_vm0, %v3602_v32  ;;  %v3705_v8 = vsel %vm1542_vm3, %v1553_v46, %v1554_v58  ;;  %v1578_v46 = vrot.slane %v3524_v57, 2 }
  0x44   : > { %2840 = vmatmul.mubr.msk.f32.gmra.mrb[8].mxu0 %vm235_vm1, %v3613_v33  ;;  %2727 = vmatmul.mubr.msk.f32.gmra.mrb[2].mxu1 %vm235_vm1, %v3390_v22  ;;  %v3687_v16 = vsel %vm1542_vm3, %v1548_v11, %v1549_v40  ;;  %v1552_v21 = vsel %vm1542_vm3, %v1549_v40, %v1551_v12  ;;  %v3719_v26 = vsel %vm1542_vm3, %v1554_v58, %v1556_v3  ;;  %v1568_v40 = vrot.slane %v3487_v49, 2 }
  0x45   : > { %2842 = vmatprep.mubr.msk.f32.mxu0 %vm235_vm1, %v3619_v42  ;;  %2729 = vmatprep.mubr.msk.f32.mxu1 %vm235_vm1, %v3402_v27  ;;  %v1573_v12 = vrot.slane %v3506_v53, 2  ;;  %v1579_v58 = vrot.slane %v3557_v2, 2 }
  0x48   : > { %2843 = vmatmul.mubr.msk.f32.gmra.mrb[10].mxu0 %vm235_vm1, %v3640_v13  ;;  %2730 = vmatmul.mubr.msk.f32.gmra.mrb[4].mxu1 %vm235_vm1, %v3405_v28 }
  0x49   : > { %2845 = vmatprep.mubr.msk.f32.mxu0 %vm235_vm1, %v3644_v59  ;;  %2732 = vmatprep.mubr.msk.f32.mxu1 %vm235_vm1, %v3432_v37 }
  0x4c   : > { %2846 = vmatmul.mubr.msk.f32.gmra.mrb[12].mxu0 %vm235_vm1, %v3657_v7  ;;  %2733 = vmatmul.mubr.msk.f32.gmra.mrb[6].mxu1 %vm235_vm1, %v3435_v38 }
  0x4d   : > { %2848 = vmatprep.mubr.msk.f32.mxu0 %vm235_vm1, %v911_v20  ;;  %2735 = vmatprep.mubr.msk.f32.mxu1 %vm235_vm1, %v3487_v49  ;;  %v3723_v20 = vsel %vm1542_vm3, %v1558_v14, %v1559_v18 }
  0x50   : > { %2849 = vmatmul.mubr.msk.f32.gmra.mrb[14].mxu0 %vm235_vm1, %v913_v23  ;;  %2736 = vmatmul.mubr.msk.f32.gmra.mrb[8].mxu1 %vm235_vm1, %v3501_v51  ;;  %v1563_v23 = vrot.slane %v3432_v37, 2 }
  0x51   : > { %2853 = vmatprep.mubr.msk.f32.mxu0 %vm235_vm1, %v1545_v10  ;;  %2738 = vmatprep.mubr.msk.f32.mxu1 %vm235_vm1, %v3506_v53  ;;  %v1566_v10 = vrot.slane %v3456_v44, 2  ;;  %v1571_v44 = vrot.slane %v3531_v60, 2  ;;  %v1576_v60 = vrot.slane %v3571_v9, 2  ;;  %v3795_v9 = vsel %vm1542_vm3, %v1578_v46, %v1579_v58 }
  0x52   : > { %v3740_v11 = vsel %vm1542_vm3, %v1563_v23, %v1564_v62 }
  0x54   : > { %2854 = vmatmul.mubr.msk.f32.vlgmr.msra.gmra.mrb[0].mxu0 %vm235_vm1, %v1547_v54  ;;  %2739 = vmatmul.mubr.msk.f32.gmra.mrb[10].mxu1 %vm235_vm1, %v3521_v56  ;;  %v3759_v54 = vsel %vm1542_vm3, %v1568_v40, %v1569_v43 }
  0x55   : > { %2878 = vmatpush3.msk.msra.mxu0 %vm284_vm0, %v3503_v52  ;;  %2856 = vmatprep.mubr.msk.f32.mxu0 %vm235_vm1, %v3687_v16  ;;  %v1561_v52 = vrot.slane %v3419_v34, 2 }
  0x56   : > { %2741 = vmatprep.mubr.msk.f32.mxu1 %vm235_vm1, %v3524_v57  ;;  %2903 = vmatprep.subr.msk.mxu0 %vm284_vm0, %v3691_v1 }
  0x57   : > { %v3736_v34 = vsel %vm1542_vm3, %v1559_v18, %v1561_v52 }
  0x58   : > { %2857 = vmatmul.mubr.msk.f32.gmra.mrb[2].mxu0 %vm235_vm1, %v1552_v21  ;;  %2742 = vmatmul.mubr.msk.f32.gmra.mrb[12].mxu1 %vm235_vm1, %v3557_v2 }
  0x59   : > { %2859 = vmatprep.mubr.msk.f32.mxu0 %vm235_vm1, %v3705_v8  ;;  %2744 = vmatprep.mubr.msk.f32.mxu1 %vm235_vm1, %v3597_v25 }
  0x5c   : > { %2860 = vmatmul.mubr.msk.f32.gmra.mrb[4].mxu0 %vm235_vm1, %v3719_v26  ;;  %2745 = vmatmul.mubr.msk.f32.gmra.mrb[14].mxu1 %vm235_vm1, %v3600_v31 }
  0x5d   : > { %2862 = vmatprep.mubr.msk.f32.mxu0 %vm235_vm1, %v3723_v20  ;;  %2749 = vmatprep.mubr.msk.f32.mxu1 %vm235_vm1, %v3378_v17  ;;  %v3753_v17 = vsel %vm1542_vm3, %v1564_v62, %v1566_v10 }
  0x60   : > { %2863 = vmatmul.mubr.msk.f32.gmra.mrb[6].mxu0 %vm235_vm1, %v3736_v34  ;;  %2750 = vmatmul.mubr.msk.f32.vlgmr.msra.gmra.mrb[0].mxu1 %vm235_vm1, %v3390_v22  ;;  %v1574_v22 = vrot.slane %v3521_v56, 2 }
  0x61   : > { %2865 = vmatprep.mubr.msk.f32.mxu0 %vm235_vm1, %v3740_v11  ;;  %2752 = vmatprep.mubr.msk.f32.mxu1 %vm235_vm1, %v3402_v27  ;;  %v3774_v27 = vsel %vm1542_vm3, %v1569_v43, %v1571_v44 }
  0x62   : > { %2774 = vmatpush3.msk.msra.mxu1 %vm284_vm0, %v3602_v32  ;;  %v3778_v32 = vsel %vm1542_vm3, %v1573_v12, %v1574_v22 }
  0x63   : > { %2929 = vmatprep.subr.msk.mxu1 %vm284_vm0, %v3334_v4 }
  0x64   : > { %2866 = vmatmul.mubr.msk.f32.gmra.mrb[8].mxu0 %vm235_vm1, %v3753_v17  ;;  %2753 = vmatmul.mubr.msk.f32.gmra.mrb[2].mxu1 %vm235_vm1, %v3405_v28  ;;  %v3791_v28 = vsel %vm1542_vm3, %v1574_v22, %v1576_v60 }
  0x65   : > { %2868 = vmatprep.mubr.msk.f32.mxu0 %vm235_vm1, %v3759_v54  ;;  %2755 = vmatprep.mubr.msk.f32.mxu1 %vm235_vm1, %v3432_v37  ;;  %v1581_v37 = vrot.slane %v3594_v24, 2 }
  0x68   : > { %2869 = vmatmul.mubr.msk.f32.gmra.mrb[10].mxu0 %vm235_vm1, %v3774_v27  ;;  %2756 = vmatmul.mubr.msk.f32.gmra.mrb[4].mxu1 %vm235_vm1, %v3435_v38  ;;  %v3806_v38 = vsel %vm1542_vm3, %v1579_v58, %v1581_v37 }
  0x69   : > { %2871 = vmatprep.mubr.msk.f32.mxu0 %vm235_vm1, %v3778_v32  ;;  %2758 = vmatprep.mubr.msk.f32.mxu1 %vm235_vm1, %v3487_v49  ;;  %v1584_v49 = vrot.slane %v3600_v31, 2 }
  0x6c   : > { %2872 = vmatmul.mubr.msk.f32.gmra.mrb[12].mxu0 %vm235_vm1, %v3791_v28  ;;  %2759 = vmatmul.mubr.msk.f32.gmra.mrb[6].mxu1 %vm235_vm1, %v3501_v51 }
  0x6d   : > { %2874 = vmatprep.mubr.msk.f32.mxu0 %vm235_vm1, %v3795_v9  ;;  %2761 = vmatprep.mubr.msk.f32.mxu1 %vm235_vm1, %v3506_v53 }
  0x70   : > { %2875 = vmatmul.mubr.msk.f32.gmra.mrb[14].mxu0 %vm235_vm1, %v3806_v38  ;;  %2762 = vmatmul.mubr.msk.f32.gmra.mrb[8].mxu1 %vm235_vm1, %v3521_v56 }
  0x71   : > { %2879 = vmatprep.mubr.msk.f32.mxu0 %vm235_vm1, %v3687_v16  ;;  %2764 = vmatprep.mubr.msk.f32.mxu1 %vm235_vm1, %v3524_v57 }
  0x74   : > { %2880 = vmatmul.mubr.msk.f32.vlgmr.msra.gmra.mrb[0].mxu0 %vm235_vm1, %v1552_v21  ;;  %2765 = vmatmul.mubr.msk.f32.gmra.mrb[10].mxu1 %vm235_vm1, %v3557_v2 }
  0x75   : > { %2904 = vmatpush3.msk.msra.mxu0 %vm284_vm0, %v3691_v1  ;;  %2882 = vmatprep.mubr.msk.f32.mxu0 %vm235_vm1, %v3705_v8 }
  0x76   : > { %2767 = vmatprep.mubr.msk.f32.mxu1 %vm235_vm1, %v3597_v25 }
  0x78   : > { %2883 = vmatmul.mubr.msk.f32.gmra.mrb[2].mxu0 %vm235_vm1, %v3719_v26  ;;  %2768 = vmatmul.mubr.msk.f32.gmra.mrb[12].mxu1 %vm235_vm1, %v3600_v31 }
  0x79   : > { %2885 = vmatprep.mubr.msk.f32.mxu0 %vm235_vm1, %v3723_v20  ;;  %2770 = vmatprep.mubr.msk.f32.mxu1 %vm235_vm1, %v3627_v55 }
  0x7c   : > { %2886 = vmatmul.mubr.msk.f32.gmra.mrb[4].mxu0 %vm235_vm1, %v3736_v34  ;;  %2771 = vmatmul.mubr.msk.f32.gmra.mrb[14].mxu1 %vm235_vm1, %v3534_v61 }
  0x7d   : > { %2888 = vmatprep.mubr.msk.f32.mxu0 %vm235_vm1, %v3740_v11  ;;  %2775 = vmatprep.mubr.msk.f32.mxu1 %vm235_vm1, %v3410_v29  ;;  %v1583_v29 = vrot.slane %v3597_v25, 2 }
  0x80   : > { %2889 = vmatmul.mubr.msk.f32.gmra.mrb[6].mxu0 %vm235_vm1, %v3753_v17  ;;  %2776 = vmatmul.mubr.msk.f32.vlgmr.msra.gmra.mrb[0].mxu1 %vm235_vm1, %v3544_v63  ;;  %v3949_v63 = vld [vmem:[%s4051_s2] ss:$0 sm:$0xff] }
  0x81   : > { %2891 = vmatprep.mubr.msk.f32.mxu0 %vm235_vm1, %v3759_v54  ;;  %2778 = vmatprep.mubr.msk.f32.mxu1 %vm235_vm1, %v3413_v30  ;;  %v1585_v30 = vsel %vm1542_vm3, %v1583_v29, %v1584_v49 }
  0x82   : > { %2930 = vmatpush3.msk.msra.mxu1 %vm284_vm0, %v3334_v4  ;;  %v1586_v4 = vrot.slane %v3624_v50, 2 }
  0x84   : > { %2892 = vmatmul.mubr.msk.f32.gmra.mrb[8].mxu0 %vm235_vm1, %v3774_v27  ;;  %2779 = vmatmul.mubr.msk.f32.gmra.mrb[2].mxu1 %vm235_vm1, %v3426_v35  ;;  %v1587_v35 = vsel %vm1542_vm3, %v1584_v49, %v1586_v4 }
  0x85   : > { %2894 = vmatprep.mubr.msk.f32.mxu0 %vm235_vm1, %v3778_v32  ;;  %2781 = vmatprep.mubr.msk.f32.mxu1 %vm235_vm1, %v3429_v36  ;;  %v1588_v36 = vrot.slane %v3627_v55, 2 }
  0x88   : > { %2895 = vmatmul.mubr.msk.f32.gmra.mrb[10].mxu0 %vm235_vm1, %v3791_v28  ;;  %2782 = vmatmul.mubr.msk.f32.gmra.mrb[4].mxu1 %vm235_vm1, %v3445_v39  ;;  %v1590_v39 = vsel %vm1542_vm3, %v1588_v36, %v1589_v0 }
  0x89   : > { %2897 = vmatprep.mubr.msk.f32.mxu0 %vm235_vm1, %v3795_v9  ;;  %2784 = vmatprep.mubr.msk.f32.mxu1 %vm235_vm1, %v3451_v41 }
  0x8c   : > { %2898 = vmatmul.mubr.msk.f32.gmra.mrb[12].mxu0 %vm235_vm1, %v3806_v38  ;;  %2785 = vmatmul.mubr.msk.f32.gmra.mrb[6].mxu1 %vm235_vm1, %v3469_v45 }
  0x8d   : > { %2900 = vmatprep.mubr.msk.f32.mxu0 %vm235_vm1, %v1585_v30  ;;  %2787 = vmatprep.mubr.msk.f32.mxu1 %vm235_vm1, %v3473_v47 }
  0x90   : > { %2901 = vmatmul.mubr.msk.f32.gmra.mrb[14].mxu0 %vm235_vm1, %v1587_v35  ;;  %2788 = vmatmul.mubr.msk.f32.gmra.mrb[8].mxu1 %vm235_vm1, %v3484_v48 }
  0x91   : > { %2905 = vmatprep.mubr.msk.f32.mxu0 %vm235_vm1, %v3705_v8  ;;  %2790 = vmatprep.mubr.msk.f32.mxu1 %vm235_vm1, %v3566_v6 }
  0x94   : > { %2906 = vmatmul.mubr.msk.f32.vlgmr.msra.gmra.mrb[0].mxu0 %vm235_vm1, %v3719_v26  ;;  %2791 = vmatmul.mubr.msk.f32.gmra.mrb[10].mxu1 %vm235_vm1, %v3585_v15 }
  0x95   : > { %2908 = vmatprep.mubr.msk.f32.mxu0 %vm235_vm1, %v3723_v20  ;;  %2793 = vmatprep.mubr.msk.f32.mxu1 %vm235_vm1, %v3589_v19 }
  0x98   : > { %2909 = vmatmul.mubr.msk.f32.gmra.mrb[2].mxu0 %vm235_vm1, %v3736_v34  ;;  %2794 = vmatmul.mubr.msk.f32.gmra.mrb[12].mxu1 %vm235_vm1, %v3613_v33 }
  0x99   : > { %2911 = vmatprep.mubr.msk.f32.mxu0 %vm235_vm1, %v3740_v11  ;;  %2796 = vmatprep.mubr.msk.f32.mxu1 %vm235_vm1, %v3619_v42 }
  0x9c   : > { %2912 = vmatmul.mubr.msk.f32.gmra.mrb[4].mxu0 %vm235_vm1, %v3753_v17  ;;  %2797 = vmatmul.mubr.msk.f32.gmra.mrb[14].mxu1 %vm235_vm1, %v3640_v13 }
  0x9d   : > { %2914 = vmatprep.mubr.msk.f32.mxu0 %vm235_vm1, %v3759_v54  ;;  %2813 = vmatprep.mubr.msk.f32.mxu1 %vm235_vm1, %v3566_v6 }
  0xa0   : > { %2915 = vmatmul.mubr.msk.f32.gmra.mrb[6].mxu0 %vm235_vm1, %v3774_v27  ;;  %2814 = vmatmul.mubr.msk.f32.vlgmr.msra.gmra.mrb[8].mxu1 %vm235_vm1, %v3585_v15 }
  0xa1   : > { %2917 = vmatprep.mubr.msk.f32.mxu0 %vm235_vm1, %v3778_v32  ;;  %2816 = vmatprep.mubr.msk.f32.mxu1 %vm235_vm1, %v3589_v19 }
  0xa4   : > { %2918 = vmatmul.mubr.msk.f32.gmra.mrb[8].mxu0 %vm235_vm1, %v3791_v28  ;;  %2817 = vmatmul.mubr.msk.f32.gmra.mrb[10].mxu1 %vm235_vm1, %v3613_v33 }
  0xa5   : > { %2920 = vmatprep.mubr.msk.f32.mxu0 %vm235_vm1, %v3795_v9  ;;  %2819 = vmatprep.mubr.msk.f32.mxu1 %vm235_vm1, %v3619_v42 }
  0xa8   : > { %2921 = vmatmul.mubr.msk.f32.gmra.mrb[10].mxu0 %vm235_vm1, %v3806_v38  ;;  %2820 = vmatmul.mubr.msk.f32.gmra.mrb[12].mxu1 %vm235_vm1, %v3640_v13 }
  0xa9   : > { %2923 = vmatprep.mubr.msk.f32.mxu0 %vm235_vm1, %v1585_v30  ;;  %2822 = vmatprep.mubr.msk.f32.mxu1 %vm235_vm1, %v3644_v59 }
  0xac   : > { %2924 = vmatmul.mubr.msk.f32.gmra.mrb[12].mxu0 %vm235_vm1, %v1587_v35  ;;  %2823 = vmatmul.mubr.msk.f32.gmra.mrb[14].mxu1 %vm235_vm1, %v3657_v7 }
  0xad   : > { %2926 = vmatprep.mubr.msk.f32.mxu0 %vm235_vm1, %v1590_v39 }
  0xb0   : > { %2927 = vmatmul.mubr.msk.f32.gmra.mrb[14].mxu0 %vm235_vm1, %v3563_v5 }
 0x153   : > { %v2777_v41 = vpop.f32.mrb[0].mxu1 }
 0x154   : > { %v1015_v45 = vpop.f32.mrb[1].mxu1 }
 0x157   : > { %v2780_v47 = vpop.f32.mrb[2].mxu1 }
 0x158   : > { %v1025_v48 = vpop.f32.mrb[3].mxu1 }
 0x15b   : > { %v2783_v51 = vpop.f32.mrb[4].mxu1 }
 0x15c   : > { %v1035_v53 = vpop.f32.mrb[5].mxu1 }
 0x15f   : > { %v2786_v56 = vpop.f32.mrb[6].mxu1 }
 0x160   : > { %v1045_v57 = vpop.f32.mrb[7].mxu1 }
 0x167   : > { %v2907_v61 = vpop.f32.mrb[0].mxu0 }
 0x168   : > { %v2931_v0 = vadd.f32 %v2907_v61, %v2777_v41  ;;  %v2094_v2 = vpop.f32.mrb[1].mxu0 }
 0x169   : > { %v2932_v5 = vadd.f32 %v2094_v2, %v1015_v45 }
 0x16a   : > { %v2245_v6 = vadd.f32 %v2931_v0, %v3949_v63 }
 0x16b   : > { %v2244_v15 = vadd.f32 %v2932_v5, %v3949_v63  ;;  %v2910_v19 = vpop.f32.mrb[2].mxu0 }
 0x16c   : > { %2261 = vst [vmem:[%s3953_s5 + $0x8] sm:$0xff] %v2245_v6  ;;  %v2933_v24 = vadd.f32 %v2910_v19, %v2780_v47  ;;  %v2104_v25 = vpop.f32.mrb[3].mxu0 }
 0x16d   : > { %2260 = vst [vmem:[%s3953_s5] sm:$0xff] %v2244_v15  ;;  %v2934_v31 = vadd.f32 %v2104_v25, %v1025_v48 }
 0x16e   : > { %v2247_v33 = vadd.f32 %v2933_v24, %v3949_v63 }
 0x16f   : > { %v2246_v42 = vadd.f32 %v2934_v31, %v3949_v63  ;;  %v2913_v50 = vpop.f32.mrb[4].mxu0 }
 0x170   : > { %2263 = vst [vmem:[%s3953_s5 + $0x18] sm:$0xff] %v2247_v33  ;;  %v2935_v55 = vadd.f32 %v2913_v50, %v2783_v51  ;;  %v2114_v13 = vpop.f32.mrb[5].mxu0 }
 0x171   : > { %2262 = vst [vmem:[%s3953_s5 + $0x10] sm:$0xff] %v2246_v42  ;;  %v2936_v59 = vadd.f32 %v2114_v13, %v1035_v53 }
 0x172   : > { %v2249_v7 = vadd.f32 %v2935_v55, %v3949_v63 }
 0x173   : > { %v2248_v16 = vadd.f32 %v2936_v59, %v3949_v63  ;;  %v2916_v1 = vpop.f32.mrb[6].mxu0  ;;  %v2815_v21 = vpop.f32.mrb[8].mxu1 }
 0x174   : > { %2265 = vst [vmem:[%s3953_s5 + $0x28] sm:$0xff] %v2249_v7  ;;  %v2937_v3 = vadd.f32 %v2916_v1, %v2786_v56  ;;  %v2124_v8 = vpop.f32.mrb[7].mxu0  ;;  %v1255_v14 = vpop.f32.mrb[9].mxu1 }
 0x175   : > { %2264 = vst [vmem:[%s3953_s5 + $0x20] sm:$0xff] %v2248_v16  ;;  %v2938_v18 = vadd.f32 %v2124_v8, %v1045_v57 }
 0x176   : > { %v2251_v26 = vadd.f32 %v2937_v3, %v3949_v63 }
 0x177   : > { %v2250_v52 = vadd.f32 %v2938_v18, %v3949_v63  ;;  %v2919_v20 = vpop.f32.mrb[8].mxu0  ;;  %v2818_v23 = vpop.f32.mrb[10].mxu1 }
 0x178   : > { %2267 = vst [vmem:[%s3953_s5 + $0x38] sm:$0xff] %v2251_v26  ;;  %v2939_v62 = vadd.f32 %v2919_v20, %v2815_v21  ;;  %v2134_v34 = vpop.f32.mrb[9].mxu0  ;;  %v1265_v10 = vpop.f32.mrb[11].mxu1 }
 0x179   : > { %2266 = vst [vmem:[%s3953_s5 + $0x30] sm:$0xff] %v2250_v52  ;;  %v2940_v11 = vadd.f32 %v2134_v34, %v1255_v14 }
 0x17a   : > { %v2253_v40 = vadd.f32 %v2939_v62, %v3949_v63 }
 0x17b   : > { %v2252_v43 = vadd.f32 %v2940_v11, %v3949_v63  ;;  %v2922_v17 = vpop.f32.mrb[10].mxu0  ;;  %v2821_v44 = vpop.f32.mrb[12].mxu1 }
 0x17c   : > { %2269 = vst [vmem:[%s3953_s5 + $0x48] sm:$0xff] %v2253_v40  ;;  %v2941_v54 = vadd.f32 %v2922_v17, %v2818_v23  ;;  %v2144_v12 = vpop.f32.mrb[11].mxu0  ;;  %v1275_v22 = vpop.f32.mrb[13].mxu1 }
 0x17d   : > { %2268 = vst [vmem:[%s3953_s5 + $0x40] sm:$0xff] %v2252_v43  ;;  %v2942_v27 = vadd.f32 %v2144_v12, %v1265_v10 }
 0x17e   : > { %v2255_v60 = vadd.f32 %v2941_v54, %v3949_v63 }
 0x17f   : > { %v2254_v32 = vadd.f32 %v2942_v27, %v3949_v63  ;;  %v2925_v46 = vpop.f32.mrb[12].mxu0  ;;  %v2824_v58 = vpop.f32.mrb[14].mxu1 }
 0x180   : > { %2271 = vst [vmem:[%s3953_s5 + $0x58] sm:$0xff] %v2255_v60  ;;  %v2943_v28 = vadd.f32 %v2925_v46, %v2821_v44  ;;  %v2154_v37 = vpop.f32.mrb[13].mxu0  ;;  %v1285_v9 = vpop.f32.mrb[15].mxu1 }
 0x181   : > { %2270 = vst [vmem:[%s3953_s5 + $0x50] sm:$0xff] %v2254_v32  ;;  %v2944_v38 = vadd.f32 %v2154_v37, %v1275_v22 }
 0x182   : > { %v2257_v29 = vadd.f32 %v2943_v28, %v3949_v63 }
 0x183   : > { %v2256_v49 = vadd.f32 %v2944_v38, %v3949_v63  ;;  %v2928_v4 = vpop.f32.mrb[14].mxu0 }
 0x184   : > { %2273 = vst [vmem:[%s3953_s5 + $0x68] sm:$0xff] %v2257_v29  ;;  %v2945_v30 = vadd.f32 %v2928_v4, %v2824_v58  ;;  %v2164_v35 = vpop.f32.mrb[15].mxu0 }
 0x185   : > { %2272 = vst [vmem:[%s3953_s5 + $0x60] sm:$0xff] %v2256_v49  ;;  %v2946_v36 = vadd.f32 %v2164_v35, %v1285_v9 }
 0x186   : > { %v2259_v39 = vadd.f32 %v2945_v30, %v3949_v63 }
 0x187   : > { %v2258_v41 = vadd.f32 %v2946_v36, %v3949_v63 }
 0x188   : > { %2275 = vst [vmem:[%s3953_s5 + $0x78] sm:$0xff] %v2259_v39 }
 0x189   : > { %2274 = vst [vmem:[%s3953_s5 + $0x70] sm:$0xff] %v2258_v41 }
 0x18a   : > { %3146 = shalt.err (!%p3143_p6)
}
 0x18b   : > { %s3147_s27 = scalar_lea.hbm %s3988_s11, 2048  ;;  %s3151_s6 = scalar_lea.hbm %s4052_s3, 8192 }
 0x18c   : > { %p3148_p7 = scmp.ne.s32.totalorder %s3988_s11, %s3147_s27  ;;  %p3152_p11 = scmp.lt.u32.totalorder %s3988_s11, %s4052_s3 }
 0x18d   : > { %p3153_p12 = scmp.lt.u32.totalorder %s3151_s6, %s3147_s27  ;;  %p3155_p0 = scmp.lt.u32.totalorder %s3147_s27, %s3988_s11 }
 0x18e   : > { %p3149_p9 = pnand %p3148_p7, %p3303_p3 }
 0x18f   : > { %p3154_p13 = por %p3153_p12, %p3152_p11 }
 0x190   : > { %p3150_p10 = pneg %p3149_p9 }
 0x191   : > { %p3156_p1 = por %p3155_p0, %p3154_p13 }
 0x193   : > { %p3157_p2 = pnand %p3156_p1, %p3150_p10 }
 0x195   : > { %3160 = shalt.err (!%p3157_p2)
}
 0x196   : > { %s3230_s15 = smov 128   ;;  %s3231_s9 = smov 8  }
 0x197   : > { %3060 = dma.vmem_to_hbm [thread:$0]  (%p3303_p3), %s3990_s16, 2048, %s3988_s11, %s3997_s20, %s3230_s15, %s3230_s15, %s3231_s9  }
 0x198 PF: > { %p3066_p4 = scmp.ge.s32.totalorder %s3227_s19, 2  ;;  %s2308_s10 = sand.u32 1, %s3199_s12  }
 0x199   : > { %s2309_s21 = scalar_lea.sflag [#allocation4], %s2308_s10 }
 0x19a   : > { %p3063_p5 = pnand %p3066_p4, %p3312_p8 }
 0x19c   : > { %3194 = dma.done.wait (!%p3063_p5), %s2309_s21, 2048  }
 0x19d   : > { %3196 = vsyncadd (!%p3063_p5), %s2309_s21, 4294965248  ;;  %s16_s19 = sadd.s32 1, %s3227_s19   ;;  %s4055_s12 = smov %s3203_s13 }
 0x19e   : > { %p13_p6 = scmp.ge.s32.totalorder %s16_s19, 6   ;;  %s4056_s13 = smov %s3207_s14 }
 0x19f   : > { %s4057_s14 = smov %s3321_s30  ;;  %s4058_s15 = smov %s3219_s17 }
 0x1a0   : > { %s4059_s16 = smov %s3223_s18  ;;  %s4060_s17 = smov %s4063_s22 }
 0x1a1   : > { %s4061_s18 = smov %s4067_s23  ;;  %15 = sbr.rel (!%p13_p6) target bundleno = 5 (0x5), region = 68 }
 0x1a8   :  { %2314 = vsyncpa [#allocation4], 1 }
 0x1a9   :  { %2316 = vsyncpa [#allocation4 + $0x1], 1 }

</bundles_post_ra>
